<compile_context>
chip_gen: v7x
topology: tpu7x:2x2x1
jax: 0.10.0
libtpu: 0.0.40
codegen_flags: <defaults>
</compile_context>

<pallas_src>
import functools

import jax
import jax.numpy as jnp
from jax.experimental import pallas as pl
from jax.experimental.pallas import tpu as pltpu


def _round_up(n, m):
    return ((n + m - 1) // m) * m


def _fused_kernel(x_ref, w_ref, b_ref, o_ref):
    # x_ref: [TR, 128] f32 -- 16 samples per row, 8 contiguous feature lanes each
    #        (free bitcast view of the natural row-major [B, 8] input).
    # w_ref: [1, 128]  f32 -- fused weight tiled 16x along lanes (w[l] = w_fused[l % 8]).
    # b_ref: [1]       f32 -- fused bias (SMEM scalar).
    # o_ref: [TR, 16]  f32 -- one LogSigmoid output per sample (bitcasts back to [B, 1]).
    y = x_ref[...] * w_ref[...]                      # VPU, exact f32

    # Segmented sum of each 8-lane feature group: result lands at lane 8*s + 7.
    y = y + pltpu.roll(y, 1, 1)
    y = y + pltpu.roll(y, 2, 1)
    y = y + pltpu.roll(y, 4, 1)

    # Compact the 16 per-row results (lanes 8s+7) into a dense group of 16
    # lanes using XLU rolls + VPU selects on constant lane masks.  The MXU is
    # intentionally unused; all of this sits in otherwise-idle VLIW slots.
    lane = jax.lax.broadcasted_iota(jnp.int32, (1, 128), 1)
    m1 = (lane % 16) == 14
    m2 = ((lane % 32) >= 28) & ((lane % 32) <= 29)
    m3 = ((lane % 64) >= 56) & ((lane % 64) <= 59)
    m4 = (lane >= 112) & (lane <= 119)
    y = jnp.where(m1, pltpu.roll(y, 7, 1), y)    # {7,15}        -> {14,15}   per 16 lanes
    y = jnp.where(m2, pltpu.roll(y, 14, 1), y)   # {14,15,30,31} -> {28..31}  per 32 lanes
    y = jnp.where(m3, pltpu.roll(y, 28, 1), y)   # {28..31,...}  -> {56..63}  per 64 lanes
    y = jnp.where(m4, pltpu.roll(y, 56, 1), y)   # {56..63,...}  -> {112..127}
    z = pltpu.roll(y, 16, 1)[:, :16] + b_ref[0]  # dense [TR, 16] + fused bias

    # LogSigmoid(z) = min(z, 0) - log1p(exp(-|z|))   (numerically stable; EUP)
    o_ref[...] = (jnp.minimum(z, 0.0)
                  - jnp.log1p(jnp.exp(-jnp.abs(z)))).astype(o_ref.dtype)


@functools.partial(jax.jit, static_argnames=("tile_rows",))
def prediction_forward(x, params, tile_rows=4096):
    """x: [B, 8] float32. Returns [B, 1] float32 = LogSigmoid(L3(L2(L1(x))))."""
    B = x.shape[0]
    hp = jax.lax.Precision.HIGHEST

    # --- Algebraic fusion of the three bias-affine layers (tiny matmuls). ---
    w12 = jnp.dot(params["w1"], params["w2"], precision=hp)                # [8, 30]
    w_fused = jnp.dot(w12, params["w3"], precision=hp).reshape(8)          # [8]
    b12 = jnp.dot(params["b1"], params["w2"], precision=hp) + params["b2"]
    b_fused = (jnp.dot(b12, params["w3"], precision=hp)
               + params["b3"]).reshape((1,))                               # [1]
    w_tiled = jnp.tile(w_fused, 16).reshape(1, 128)                        # [1, 128]

    # --- Lane-dense bitcast view: row-major [B,8] is bit-identical to [B/16,128].
    # Pads at most 15 rows and only when B is not a multiple of 16.
    b16 = _round_up(max(B, 1), 16)
    if b16 != B:
        # TODO(synk): a dedicated tail block would avoid even this small copy.
        x = jnp.pad(x, ((0, b16 - B), (0, 0)))
    n_rows = b16 // 16
    x_view = x.reshape(n_rows, 128)          # free bitcast, no extra HBM pass

    # --- Row tiling: 2 MiB lane-dense input blocks (tile_rows=4096) amortize the
    # per-step overhead; aim for >=2 grid steps so the "parallel" batch axis can
    # shard across both v7x TensorCores.  VMEM (double-buffered in + out) is
    # ~tile_r * 2 KiB = 8 MiB at the default tile -> safe on v5e/v6e/v7x.
    if n_rows <= 8:
        tile_r = n_rows
    else:
        tile_r = min(tile_rows, _round_up(pl.cdiv(n_rows, 2), 8))
    grid_r = pl.cdiv(n_rows, tile_r)

    out = pl.pallas_call(
        _fused_kernel,
        out_shape=jax.ShapeDtypeStruct((n_rows, 16), jnp.float32),
        grid=(grid_r,),
        in_specs=[
            pl.BlockSpec((tile_r, 128), lambda i: (i, 0)),        # x tiles (pipelined)
            pl.BlockSpec((1, 128), lambda i: (0, 0)),             # fused weight (resident)
            pl.BlockSpec(memory_space=pltpu.MemorySpace.SMEM),    # scalar fused bias
        ],
        out_specs=pl.BlockSpec((tile_r, 16), lambda i: (i, 0)),
        compiler_params=pltpu.CompilerParams(
            dimension_semantics=("parallel",),      # shard batch tiles over TCs (v7x)
            vmem_limit_bytes=32 * 1024 * 1024),
    )(x_view, w_tiled, b_fused)

    # [n_rows,16] row-major is bit-identical to [b16,1]; drop padded samples.
    return out.reshape(b16, 1)[:B]


def init_params(key):
    """Deterministic init matching nn.Linear shapes (stored transposed: [in, out])."""
    ks = jax.random.split(key, 6)

    def linear(kw, kb, fan_in, fan_out):
        bound = 1.0 / jnp.sqrt(fan_in)
        w = jax.random.uniform(kw, (fan_in, fan_out), jnp.float32, -bound, bound)
        b = jax.random.uniform(kb, (1, fan_out), jnp.float32, -bound, bound)
        return w, b

    w1, b1 = linear(ks[0], ks[1], 8, 30)
    w2, b2 = linear(ks[2], ks[3], 30, 30)
    w3, b3 = linear(ks[4], ks[5], 30, 1)
    return {"w1": w1, "b1": b1, "w2": w2, "b2": b2, "w3": w3, "b3": b3}


def _reference(x, p):
    """Un-fused layer-by-layer reference (matches the PyTorch forward)."""
    h = x @ p["w1"] + p["b1"]
    h = h @ p["w2"] + p["b2"]
    z = h @ p["w3"] + p["b3"]
    return jnp.minimum(z, 0.0) - jnp.log1p(jnp.exp(-jnp.abs(z)))


if __name__ == "__main__":
    key = jax.random.PRNGKey(0)
    k1, k2, k3, kp = jax.random.split(key, 4)
    params = init_params(kp)

    # Small batch: single grid step, whole-array block (no padding needed).
    B1 = 32
    x1 = jax.random.normal(k1, (B1, 8), jnp.float32)
    out1 = jax.block_until_ready(prediction_forward(x1, params))
    ref1 = _reference(x1, params)
    assert out1.shape == (B1, 1)
    assert jnp.allclose(out1, ref1, atol=1e-5, rtol=1e-5), \
        float(jnp.max(jnp.abs(out1 - ref1)))

    # Batch not a multiple of 16: exercises the 16-alignment pad, a 2-step
    # "parallel" grid and a partial last block.
    B2 = 300
    x2 = jax.random.normal(k2, (B2, 8), jnp.float32)
    out2 = jax.block_until_ready(prediction_forward(x2, params))
    ref2 = _reference(x2, params)
    assert out2.shape == (B2, 1)
    assert jnp.allclose(out2, ref2, atol=1e-5, rtol=1e-5), \
        float(jnp.max(jnp.abs(out2 - ref2)))

    # 16-aligned batch with a multi-step grid and full (8-aligned) blocks.
    B3 = 1024
    x3 = jax.random.normal(k3, (B3, 8), jnp.float32)
    out3 = jax.block_until_ready(prediction_forward(x3, params))
    ref3 = _reference(x3, params)
    assert out3.shape == (B3, 1)
    assert jnp.allclose(out3, ref3, atol=1e-5, rtol=1e-5), \
        float(jnp.max(jnp.abs(out3 - ref3)))

    print("KERNEL_OK")
</pallas_src>

<mosaic_0001>
module attributes {stable_mosaic.version = 11 : i64} {
  func.func @_fused_kernel(%arg0: i32, %arg1: memref<2x128xf32, #tpu.memory_space<vmem>>, %arg2: memref<1x128xf32, #tpu.memory_space<vmem>>, %arg3: memref<1xf32, #tpu.memory_space<smem>>, %arg4: memref<2x16xf32, #tpu.memory_space<vmem>>) attributes {dimension_semantics = [#tpu.dimension_semantics<parallel>], iteration_bounds = array<i64: 1>, scalar_prefetch = 0 : i64, scratch_operands = 0 : i64, tpu.core_type = #tpu.core_type<tc>, window_params = [{transform_indices = @transform_0, window_bounds = array<i64: 2, 128>}, {pipeline_mode = #tpu.pipeline_mode<synchronous>, transform_indices = @transform_1, window_bounds = array<i64: 1, 128>}, {transform_indices = @transform_2, window_bounds = array<i64: 1>}, {transform_indices = @transform_3, window_bounds = array<i64: 2, 16>}]} {
    %c0 = arith.constant 0 : index
    %c0_0 = arith.constant 0 : index
    %0 = vector.load %arg1[%c0, %c0_0] : memref<2x128xf32, #tpu.memory_space<vmem>>, vector<2x128xf32>
    %c0_1 = arith.constant 0 : index
    %c0_2 = arith.constant 0 : index
    %1 = vector.load %arg2[%c0_1, %c0_2] : memref<1x128xf32, #tpu.memory_space<vmem>>, vector<1x128xf32>
    %2 = vector.broadcast %1 : vector<1x128xf32> to vector<2x128xf32>
    %3 = arith.mulf %0, %2 : vector<2x128xf32>
    %c1_i32 = arith.constant 1 : i32
    %4 = tpu.dynamic_rotate %3 by %c1_i32 dim 1 : vector<2x128xf32>, i32 -> vector<2x128xf32>
    %5 = arith.addf %3, %4 : vector<2x128xf32>
    %c2_i32 = arith.constant 2 : i32
    %6 = tpu.dynamic_rotate %5 by %c2_i32 dim 1 : vector<2x128xf32>, i32 -> vector<2x128xf32>
    %7 = arith.addf %5, %6 : vector<2x128xf32>
    %c4_i32 = arith.constant 4 : i32
    %8 = tpu.dynamic_rotate %7 by %c4_i32 dim 1 : vector<2x128xf32>, i32 -> vector<2x128xf32>
    %9 = arith.addf %7, %8 : vector<2x128xf32>
    %10 = tpu.iota {dimensions = array<i32: 1>} : vector<1x128xi32>
    %c16_i32 = arith.constant 16 : i32
    %c0_i32 = arith.constant 0 : i32
    %11 = arith.cmpi eq, %c16_i32, %c0_i32 : i32
    %c1_i32_3 = arith.constant 1 : i32
    %12 = arith.select %11, %c1_i32_3, %c16_i32 : i32
    %13 = vector.broadcast %12 : i32 to vector<1x128xi32>
    %14 = arith.remsi %10, %13 : vector<1x128xi32>
    %c0_i32_4 = arith.constant 0 : i32
    %15 = vector.broadcast %c0_i32_4 : i32 to vector<1x128xi32>
    %16 = arith.cmpi ne, %14, %15 : vector<1x128xi32>
    %c0_i32_5 = arith.constant 0 : i32
    %17 = vector.broadcast %c0_i32_5 : i32 to vector<1x128xi32>
    %18 = arith.cmpi slt, %14, %17 : vector<1x128xi32>
    %c0_i32_6 = arith.constant 0 : i32
    %19 = arith.cmpi slt, %12, %c0_i32_6 : i32
    %20 = vector.broadcast %19 : i1 to vector<1x128xi1>
    %21 = vector.broadcast %20 : vector<1x128xi1> to vector<1x128xi1>
    %22 = arith.xori %18, %21 : vector<1x128xi1>
    %23 = arith.andi %22, %16 : vector<1x128xi1>
    %24 = vector.broadcast %12 : i32 to vector<1x128xi32>
    %25 = arith.addi %14, %24 : vector<1x128xi32>
    %26 = arith.select %23, %25, %14 : vector<1x128xi1>, vector<1x128xi32>
    %c14_i32 = arith.constant 14 : i32
    %27 = vector.broadcast %c14_i32 : i32 to vector<1x128xi32>
    %28 = arith.cmpi eq, %26, %27 : vector<1x128xi32>
    %c32_i32 = arith.constant 32 : i32
    %c0_i32_7 = arith.constant 0 : i32
    %29 = arith.cmpi eq, %c32_i32, %c0_i32_7 : i32
    %c1_i32_8 = arith.constant 1 : i32
    %30 = arith.select %29, %c1_i32_8, %c32_i32 : i32
    %31 = vector.broadcast %30 : i32 to vector<1x128xi32>
    %32 = arith.remsi %10, %31 : vector<1x128xi32>
    %c0_i32_9 = arith.constant 0 : i32
    %33 = vector.broadcast %c0_i32_9 : i32 to vector<1x128xi32>
    %34 = arith.cmpi ne, %32, %33 : vector<1x128xi32>
    %c0_i32_10 = arith.constant 0 : i32
    %35 = vector.broadcast %c0_i32_10 : i32 to vector<1x128xi32>
    %36 = arith.cmpi slt, %32, %35 : vector<1x128xi32>
    %c0_i32_11 = arith.constant 0 : i32
    %37 = arith.cmpi slt, %30, %c0_i32_11 : i32
    %38 = vector.broadcast %37 : i1 to vector<1x128xi1>
    %39 = vector.broadcast %38 : vector<1x128xi1> to vector<1x128xi1>
    %40 = arith.xori %36, %39 : vector<1x128xi1>
    %41 = arith.andi %40, %34 : vector<1x128xi1>
    %42 = vector.broadcast %30 : i32 to vector<1x128xi32>
    %43 = arith.addi %32, %42 : vector<1x128xi32>
    %44 = arith.select %41, %43, %32 : vector<1x128xi1>, vector<1x128xi32>
    %c28_i32 = arith.constant 28 : i32
    %45 = vector.broadcast %c28_i32 : i32 to vector<1x128xi32>
    %46 = arith.cmpi sge, %44, %45 : vector<1x128xi32>
    %c32_i32_12 = arith.constant 32 : i32
    %c0_i32_13 = arith.constant 0 : i32
    %47 = arith.cmpi eq, %c32_i32_12, %c0_i32_13 : i32
    %c1_i32_14 = arith.constant 1 : i32
    %48 = arith.select %47, %c1_i32_14, %c32_i32_12 : i32
    %49 = vector.broadcast %48 : i32 to vector<1x128xi32>
    %50 = arith.remsi %10, %49 : vector<1x128xi32>
    %c0_i32_15 = arith.constant 0 : i32
    %51 = vector.broadcast %c0_i32_15 : i32 to vector<1x128xi32>
    %52 = arith.cmpi ne, %50, %51 : vector<1x128xi32>
    %c0_i32_16 = arith.constant 0 : i32
    %53 = vector.broadcast %c0_i32_16 : i32 to vector<1x128xi32>
    %54 = arith.cmpi slt, %50, %53 : vector<1x128xi32>
    %c0_i32_17 = arith.constant 0 : i32
    %55 = arith.cmpi slt, %48, %c0_i32_17 : i32
    %56 = vector.broadcast %55 : i1 to vector<1x128xi1>
    %57 = vector.broadcast %56 : vector<1x128xi1> to vector<1x128xi1>
    %58 = arith.xori %54, %57 : vector<1x128xi1>
    %59 = arith.andi %58, %52 : vector<1x128xi1>
    %60 = vector.broadcast %48 : i32 to vector<1x128xi32>
    %61 = arith.addi %50, %60 : vector<1x128xi32>
    %62 = arith.select %59, %61, %50 : vector<1x128xi1>, vector<1x128xi32>
    %c29_i32 = arith.constant 29 : i32
    %63 = vector.broadcast %c29_i32 : i32 to vector<1x128xi32>
    %64 = arith.cmpi sle, %62, %63 : vector<1x128xi32>
    %65 = arith.andi %46, %64 : vector<1x128xi1>
    %c64_i32 = arith.constant 64 : i32
    %c0_i32_18 = arith.constant 0 : i32
    %66 = arith.cmpi eq, %c64_i32, %c0_i32_18 : i32
    %c1_i32_19 = arith.constant 1 : i32
    %67 = arith.select %66, %c1_i32_19, %c64_i32 : i32
    %68 = vector.broadcast %67 : i32 to vector<1x128xi32>
    %69 = arith.remsi %10, %68 : vector<1x128xi32>
    %c0_i32_20 = arith.constant 0 : i32
    %70 = vector.broadcast %c0_i32_20 : i32 to vector<1x128xi32>
    %71 = arith.cmpi ne, %69, %70 : vector<1x128xi32>
    %c0_i32_21 = arith.constant 0 : i32
    %72 = vector.broadcast %c0_i32_21 : i32 to vector<1x128xi32>
    %73 = arith.cmpi slt, %69, %72 : vector<1x128xi32>
    %c0_i32_22 = arith.constant 0 : i32
    %74 = arith.cmpi slt, %67, %c0_i32_22 : i32
    %75 = vector.broadcast %74 : i1 to vector<1x128xi1>
    %76 = vector.broadcast %75 : vector<1x128xi1> to vector<1x128xi1>
    %77 = arith.xori %73, %76 : vector<1x128xi1>
    %78 = arith.andi %77, %71 : vector<1x128xi1>
    %79 = vector.broadcast %67 : i32 to vector<1x128xi32>
    %80 = arith.addi %69, %79 : vector<1x128xi32>
    %81 = arith.select %78, %80, %69 : vector<1x128xi1>, vector<1x128xi32>
    %c56_i32 = arith.constant 56 : i32
    %82 = vector.broadcast %c56_i32 : i32 to vector<1x128xi32>
    %83 = arith.cmpi sge, %81, %82 : vector<1x128xi32>
    %c64_i32_23 = arith.constant 64 : i32
    %c0_i32_24 = arith.constant 0 : i32
    %84 = arith.cmpi eq, %c64_i32_23, %c0_i32_24 : i32
    %c1_i32_25 = arith.constant 1 : i32
    %85 = arith.select %84, %c1_i32_25, %c64_i32_23 : i32
    %86 = vector.broadcast %85 : i32 to vector<1x128xi32>
    %87 = arith.remsi %10, %86 : vector<1x128xi32>
    %c0_i32_26 = arith.constant 0 : i32
    %88 = vector.broadcast %c0_i32_26 : i32 to vector<1x128xi32>
    %89 = arith.cmpi ne, %87, %88 : vector<1x128xi32>
    %c0_i32_27 = arith.constant 0 : i32
    %90 = vector.broadcast %c0_i32_27 : i32 to vector<1x128xi32>
    %91 = arith.cmpi slt, %87, %90 : vector<1x128xi32>
    %c0_i32_28 = arith.constant 0 : i32
    %92 = arith.cmpi slt, %85, %c0_i32_28 : i32
    %93 = vector.broadcast %92 : i1 to vector<1x128xi1>
    %94 = vector.broadcast %93 : vector<1x128xi1> to vector<1x128xi1>
    %95 = arith.xori %91, %94 : vector<1x128xi1>
    %96 = arith.andi %95, %89 : vector<1x128xi1>
    %97 = vector.broadcast %85 : i32 to vector<1x128xi32>
    %98 = arith.addi %87, %97 : vector<1x128xi32>
    %99 = arith.select %96, %98, %87 : vector<1x128xi1>, vector<1x128xi32>
    %c59_i32 = arith.constant 59 : i32
    %100 = vector.broadcast %c59_i32 : i32 to vector<1x128xi32>
    %101 = arith.cmpi sle, %99, %100 : vector<1x128xi32>
    %102 = arith.andi %83, %101 : vector<1x128xi1>
    %c112_i32 = arith.constant 112 : i32
    %103 = vector.broadcast %c112_i32 : i32 to vector<1x128xi32>
    %104 = arith.cmpi sge, %10, %103 : vector<1x128xi32>
    %c119_i32 = arith.constant 119 : i32
    %105 = vector.broadcast %c119_i32 : i32 to vector<1x128xi32>
    %106 = arith.cmpi sle, %10, %105 : vector<1x128xi32>
    %107 = arith.andi %104, %106 : vector<1x128xi1>
    %c7_i32 = arith.constant 7 : i32
    %108 = tpu.dynamic_rotate %9 by %c7_i32 dim 1 : vector<2x128xf32>, i32 -> vector<2x128xf32>
    %109 = vector.shape_cast %28 : vector<1x128xi1> to vector<1x128xi1>
    %110 = vector.broadcast %109 : vector<1x128xi1> to vector<2x128xi1>
    %111 = arith.select %110, %108, %9 : vector<2x128xi1>, vector<2x128xf32>
    %c14_i32_29 = arith.constant 14 : i32
    %112 = tpu.dynamic_rotate %111 by %c14_i32_29 dim 1 : vector<2x128xf32>, i32 -> vector<2x128xf32>
    %113 = vector.shape_cast %65 : vector<1x128xi1> to vector<1x128xi1>
    %114 = vector.broadcast %113 : vector<1x128xi1> to vector<2x128xi1>
    %115 = arith.select %114, %112, %111 : vector<2x128xi1>, vector<2x128xf32>
    %c28_i32_30 = arith.constant 28 : i32
    %116 = tpu.dynamic_rotate %115 by %c28_i32_30 dim 1 : vector<2x128xf32>, i32 -> vector<2x128xf32>
    %117 = vector.shape_cast %102 : vector<1x128xi1> to vector<1x128xi1>
    %118 = vector.broadcast %117 : vector<1x128xi1> to vector<2x128xi1>
    %119 = arith.select %118, %116, %115 : vector<2x128xi1>, vector<2x128xf32>
    %c56_i32_31 = arith.constant 56 : i32
    %120 = tpu.dynamic_rotate %119 by %c56_i32_31 dim 1 : vector<2x128xf32>, i32 -> vector<2x128xf32>
    %121 = vector.shape_cast %107 : vector<1x128xi1> to vector<1x128xi1>
    %122 = vector.broadcast %121 : vector<1x128xi1> to vector<2x128xi1>
    %123 = arith.select %122, %120, %119 : vector<2x128xi1>, vector<2x128xf32>
    %c16_i32_32 = arith.constant 16 : i32
    %124 = tpu.dynamic_rotate %123 by %c16_i32_32 dim 1 : vector<2x128xf32>, i32 -> vector<2x128xf32>
    %125 = vector.extract_strided_slice %124 {offsets = [0, 0], sizes = [2, 16], strides = [1, 1]} : vector<2x128xf32> to vector<2x16xf32>
    %c0_33 = arith.constant 0 : index
    %126 = memref.load %arg3[%c0_33] : memref<1xf32, #tpu.memory_space<smem>>
    %127 = vector.broadcast %126 : f32 to vector<2x16xf32>
    %128 = arith.addf %125, %127 : vector<2x16xf32>
    %cst = arith.constant 0.000000e+00 : f32
    %129 = vector.broadcast %cst : f32 to vector<2x16xf32>
    %130 = arith.minimumf %128, %129 : vector<2x16xf32>
    %131 = math.absf %128 : vector<2x16xf32>
    %cst_34 = arith.constant 0.000000e+00 : f32
    %132 = vector.broadcast %cst_34 : f32 to vector<2x16xf32>
    %133 = arith.subf %132, %131 : vector<2x16xf32>
    %134 = math.exp %133 : vector<2x16xf32>
    %135 = math.log1p %134 : vector<2x16xf32>
    %136 = arith.subf %130, %135 : vector<2x16xf32>
    %c0_35 = arith.constant 0 : index
    %c0_36 = arith.constant 0 : index
    %137 = vector.load %arg4[%c0_35, %c0_36] : memref<2x16xf32, #tpu.memory_space<vmem>>, vector<2x16xf32>
    tpu.vector_store %arg4[%c0_35, %c0_36], %136 {strides = array<i32>} : memref<2x16xf32, #tpu.memory_space<vmem>>, vector<2x16xf32>,
    return
  }
  func.func @transform_0(%arg0: i32) -> (i32, i32) {
    %c0_i32 = arith.constant 0 : i32
    %c0_i32_0 = arith.constant 0 : i32
    return %arg0, %c0_i32 : i32, i32
  }
  func.func @transform_1(%arg0: i32) -> (i32, i32) {
    %c0_i32 = arith.constant 0 : i32
    %c0_i32_0 = arith.constant 0 : i32
    %c0_i32_1 = arith.constant 0 : i32
    return %c0_i32, %c0_i32_0 : i32, i32
  }
  func.func @transform_2(%arg0: i32) -> i32 {
    %c0_i32 = arith.constant 0 : i32
    %c0_i32_0 = arith.constant 0 : i32
    return %c0_i32 : i32
  }
  func.func @transform_3(%arg0: i32) -> (i32, i32) {
    %c0_i32 = arith.constant 0 : i32
    %c0_i32_0 = arith.constant 0 : i32
    return %arg0, %c0_i32 : i32, i32
  }
}

</mosaic_0001>

<bundles_post_ra>
// kernel: tile.6
= control target key start
LH: loop header
LB: loop body
LE: loop exit
PB: predicated region body
PF: predicated region fallthrough
CT: control target
= control target key end

     0   :  { %s28_s0 = inlined_call_operand.vmem [shape: f32[8], index: 0, kind: input, shape index: {}]   ;;  %s29_s1 = inlined_call_operand.vmem [shape: f32[16,8], index: 1, kind: output, shape index: {}]  }
   0x1   :  { %v4_v0 = vld [vmem:[%s28_s0] ss:$0 sm:$0xff] }
   0x2   :  { %5 = vst [vmem:[%s29_s1] sm:$0xff] %v4_v0  ;;  %8 = vst [vmem:[%s29_s1 + $0x8] sm:$0xff] %v4_v0 }

// kernel: tile.7
= control target key start
LH: loop header
LB: loop body
LE: loop exit
PB: predicated region body
PF: predicated region fallthrough
CT: control target
= control target key end

     0   :  { %s131_s10 = smov 120   ;;  %s132_s11 = smov 104   ;;  %vm3_vm0 = vcmask 64512   ;;  %vm9_vm1 = vcmask 1048512   ;;  %vm15_vm2 = vcmask 982912   ;;  %vm21_vm3 = vcmask 917312   ;;  %s207_s0 = inlined_call_operand.vmem [shape: f32[16,8], index: 0, kind: input, shape index: {}]   ;;  %s208_s1 = inlined_call_operand.vmem [shape: f32[1,128], index: 1, kind: output, shape index: {}]  }
   0x1   :  { %v101_v0 = vld [vmem:[%s207_s0 + $0xf] sm:$0x1]   ;;  %v103_v1 = vld [vmem:[%s207_s0 + $0xd] sm:$0x1]   ;;  %v102_v2 = vld [vmem:[%s207_s0 + $0xe] sm:$0x1]  }
   0x2   :  { %7 = vrot.lane.b32.xlu0 %v101_v0, %s131_s10  ;;  %19 = vrot.lane.b32.xlu1 %v103_v1, %s132_s11  ;;  %v104_v3 = vld [vmem:[%s207_s0 + $0xc] sm:$0x1]   ;;  %s133_s16 = smov 112   ;;  %s134_s17 = smov 96   ;;  %v105_v4 = vld [vmem:[%s207_s0 + $0xb] sm:$0x1]  }
   0x3   :  { %v106_v5 = vld [vmem:[%s207_s0 + $0xa] sm:$0x1]   ;;  %v2_v6 = vld [vmem:[%s207_s0] sm:$0x1]   ;;  %s135_s24 = smov 88   ;;  %s136_s25 = smov 80  }
   0x4   :  { %4 = vst.msk [vmem:[#allocation0] sm:$0x1] %vm3_vm0, %v2_v6   ;;  %v107_v7 = vld [vmem:[%s207_s0 + $0x9] sm:$0x1]   ;;  %v108_v8 = vld [vmem:[%s207_s0 + $0x8] sm:$0x1]  }
   0x5   :  { %s137_s30 = smov 72   ;;  %s138_s2 = smov 64   ;;  %v109_v9 = vld [vmem:[%s207_s0 + $0x7] sm:$0x1]   ;;  %v110_v10 = vld [vmem:[%s207_s0 + $0x6] sm:$0x1]  }
   0x6   :  { %13 = vrot.lane.b32.xlu0 %v102_v2, %s133_s16  ;;  %25 = vrot.lane.b32.xlu1 %v104_v3, %s134_s17  ;;  %s139_s7 = smov 56   ;;  %s140_s8 = smov 48   ;;  %v111_v11 = vld [vmem:[%s207_s0 + $0x5] sm:$0x1]   ;;  %v112_v12 = vld [vmem:[%s207_s0 + $0x4] sm:$0x1]  }
   0x7   :  { %s141_s13 = smov 40   ;;  %s142_s14 = smov 32   ;;  %v113_v13 = vld [vmem:[%s207_s0 + $0x3] sm:$0x1]   ;;  %v114_v14 = vld [vmem:[%s207_s0 + $0x2] sm:$0x1]  }
   0x8   :  { %s143_s19 = smov 24   ;;  %s144_s20 = smov 16   ;;  %v115_v15 = vld [vmem:[%s207_s0 + $0x1] sm:$0x1]   ;;  %vm27_vm4 = vcmask 851712   ;;  %vm33_vm5 = vcmask 786112  }
   0x9   :  { %s145_s0 = smov 8   ;;  %vm39_vm6 = vcmask 720512   ;;  %vm45_vm7 = vcmask 654912   ;;  %vm51_vm8 = vcmask 589312   ;;  %vm57_vm9 = vcmask 523712  }
   0xa   :  { %31 = vrot.lane.b32.xlu0 %v105_v4, %s135_s24  ;;  %37 = vrot.lane.b32.xlu1 %v106_v5, %s136_s25  ;;  %vm63_vm10 = vcmask 458112   ;;  %vm69_vm11 = vcmask 392512   ;;  %vm75_vm12 = vcmask 326912   ;;  %vm81_vm13 = vcmask 261312  }
   0xb   :  { %vm87_vm14 = vcmask 195712   ;;  %vm93_vm15 = vcmask 130112  }
   0xe   :  { %43 = vrot.lane.b32.xlu0 %v107_v7, %s137_s30  ;;  %49 = vrot.lane.b32.xlu1 %v108_v8, %s138_s2 }
  0x12   :  { %55 = vrot.lane.b32.xlu0 %v109_v9, %s139_s7  ;;  %61 = vrot.lane.b32.xlu1 %v110_v10, %s140_s8 }
  0x16   :  { %67 = vrot.lane.b32.xlu0 %v111_v11, %s141_s13  ;;  %73 = vrot.lane.b32.xlu1 %v112_v12, %s142_s14 }
  0x1a   :  { %79 = vrot.lane.b32.xlu0 %v113_v13, %s143_s19  ;;  %85 = vrot.lane.b32.xlu1 %v114_v14, %s144_s20 }
  0x1e   :  { %91 = vrot.lane.b32.xlu0 %v115_v15, %s145_s0 }
  0x74   :  { %v8_v16 = vpop.permute.xlu0 %7   ;;  %v20_v17 = vpop.permute.xlu1 %19  }
  0x75   :  { %10 = vst.msk [vmem:[#allocation0] sm:$0x1] %vm9_vm1, %v8_v16  }
  0x78   :  { %v14_v18 = vpop.permute.xlu0 %13   ;;  %v26_v19 = vpop.permute.xlu1 %25  }
  0x79   :  { %16 = vst.msk [vmem:[#allocation0] sm:$0x1] %vm15_vm2, %v14_v18  }
  0x7a   :  { %22 = vst.msk [vmem:[#allocation0] sm:$0x1] %vm21_vm3, %v20_v17  }
  0x7b   :  { %28 = vst.msk [vmem:[#allocation0] sm:$0x1] %vm27_vm4, %v26_v19  }
  0x7c   :  { %v32_v20 = vpop.permute.xlu0 %31   ;;  %v38_v21 = vpop.permute.xlu1 %37  }
  0x7d   :  { %34 = vst.msk [vmem:[#allocation0] sm:$0x1] %vm33_vm5, %v32_v20  }
  0x7e   :  { %40 = vst.msk [vmem:[#allocation0] sm:$0x1] %vm39_vm6, %v38_v21  }
  0x80   :  { %v44_v22 = vpop.permute.xlu0 %43   ;;  %v50_v23 = vpop.permute.xlu1 %49  }
  0x81   :  { %46 = vst.msk [vmem:[#allocation0] sm:$0x1] %vm45_vm7, %v44_v22  }
  0x82   :  { %52 = vst.msk [vmem:[#allocation0] sm:$0x1] %vm51_vm8, %v50_v23  }
  0x84   :  { %v56_v24 = vpop.permute.xlu0 %55   ;;  %v62_v25 = vpop.permute.xlu1 %61  }
  0x85   :  { %58 = vst.msk [vmem:[#allocation0] sm:$0x1] %vm57_vm9, %v56_v24  }
  0x86   :  { %64 = vst.msk [vmem:[#allocation0] sm:$0x1] %vm63_vm10, %v62_v25  }
  0x88   :  { %v68_v26 = vpop.permute.xlu0 %67   ;;  %v74_v27 = vpop.permute.xlu1 %73  }
  0x89   :  { %70 = vst.msk [vmem:[#allocation0] sm:$0x1] %vm69_vm11, %v68_v26  }
  0x8a   :  { %76 = vst.msk [vmem:[#allocation0] sm:$0x1] %vm75_vm12, %v74_v27  }
  0x8c   :  { %v80_v28 = vpop.permute.xlu0 %79   ;;  %v86_v29 = vpop.permute.xlu1 %85  }
  0x8d   :  { %82 = vst.msk [vmem:[#allocation0] sm:$0x1] %vm81_vm13, %v80_v28  }
  0x8e   :  { %88 = vst.msk [vmem:[#allocation0] sm:$0x1] %vm87_vm14, %v86_v29  }
  0x90   :  { %v92_v30 = vpop.permute.xlu0 %91  }
  0x91   :  { %94 = vst.msk [vmem:[#allocation0] sm:$0x1] %vm93_vm15, %v92_v30  }
  0x98   :  { %v98_v31 = vld [vmem:[#allocation0] sm:$0x1] }
  0x99   :  { %100 = vst [vmem:[%s208_s1] sm:$0x1] %v98_v31 }

// kernel: prediction_forward.1
= control target key start
LH: loop header
LB: loop body
LE: loop exit
PB: predicated region body
PF: predicated region fallthrough
CT: control target
= control target key end

     0   :  { %s140_s16 = smov 1   ;;  %s141_s17 = smov 2   ;;  %v33_v9 = vlaneseq  ;;  %vm121_vm11 = vcmask 123904   ;;  %s180_s0 = inlined_call_operand.vmem [shape: f32[2,128], index: 0, kind: input, shape index: {}]   ;;  %s181_s1 = inlined_call_operand.vmem [shape: f32[1,128], index: 1, kind: input, shape index: {}]   ;;  %s182_s2 = inlined_call_operand.<no memory space> [shape: f32[1], index: 2, kind: input, shape index: {}]   ;;  %s183_s3 = inlined_call_operand.vmem [shape: f32[2,16], index: 3, kind: output, shape index: {}]  }
   0x1   :  { %v15_v0 = vld [vmem:[%s180_s0] sm:$0x3]  ;;  %s142_s18 = smov 4   ;;  %s143_s19 = smov 7   ;;  %v104_v22 = vstv %s182_s2 }
   0x2   :  { %v127_v1 = vld [vmem:[%s181_s1] ss:$0 sm:$0xff]  ;;  %v34_v10 = vand.u32 127, %v33_v9  ;;  %s144_s0 = smov 14   ;;  %s145_s1 = smov 28  }
   0x3   :  { %v23_v2 = vmul.f32 %v127_v1, %v15_v0  ;;  %s146_s20 = smov 56   ;;  %s147_s21 = smov 16  }
   0x4   :  { %v39_v11 = vand.u32 15, %v34_v10  ;;  %v52_v14 = vand.u32 31, %v34_v10  ;;  %v67_v17 = vand.u32 63, %v34_v10  ;;  %vm78_vm7 = vcmp.ge.s32.totalorder %v34_v10, 112 }
   0x5   :  { %24 = vrot.lane.b32.xlu0 %v23_v2, %s140_s16  ;;  %vm79_vm8 = vcmp.le.s32.totalorder %v34_v10, 119 }
   0x6   :  { %vm47_vm0 = vcmp.eq.s32.totalorder %v39_v11, 14  ;;  %vm60_vm1 = vcmp.ge.s32.totalorder %v52_v14, 28  ;;  %vm61_vm2 = vcmp.le.s32.totalorder %v52_v14, 29  ;;  %vm75_vm4 = vcmp.ge.s32.totalorder %v67_v17, 56  ;;  %vm80_vm9 = vmand %vm78_vm7, %vm79_vm8 }
   0x7   :  { %vm62_vm3 = vmand %vm60_vm1, %vm61_vm2  ;;  %vm76_vm5 = vcmp.le.s32.totalorder %v67_v17, 59 }
   0x8   :  { %vm77_vm6 = vmand %vm75_vm4, %vm76_vm5 }
  0x77   :  { %v25_v3 = vpop.permute.xlu0 %24 }
  0x78   :  { %v26_v4 = vadd.f32 %v25_v3, %v23_v2 }
  0x7a   :  { %27 = vrot.lane.b32.xlu0 %v26_v4, %s141_s17 }
  0xec   :  { %v28_v5 = vpop.permute.xlu0 %27 }
  0xed   :  { %v29_v6 = vadd.f32 %v28_v5, %v26_v4 }
  0xef   :  { %30 = vrot.lane.b32.xlu1 %v29_v6, %s142_s18 }
 0x161   :  { %v31_v7 = vpop.permute.xlu1 %30 }
 0x162   :  { %v32_v8 = vadd.f32 %v31_v7, %v29_v6 }
 0x164   :  { %81 = vrot.lane.b32.xlu1 %v32_v8, %s143_s19 }
 0x1d6   :  { %v82_v12 = vpop.permute.xlu1 %81 }
 0x1d7   :  { %v85_v13 = vsel %vm47_vm0, %v82_v12, %v32_v8 }
 0x1d8   :  { %86 = vrot.lane.b32.xlu0 %v85_v13, %s144_s0 }
 0x24a   :  { %v87_v15 = vpop.permute.xlu0 %86 }
 0x24b   :  { %v90_v16 = vsel %vm62_vm3, %v87_v15, %v85_v13 }
 0x24c   :  { %91 = vrot.lane.b32.xlu1 %v90_v16, %s145_s1 }
 0x2be   :  { %v92_v18 = vpop.permute.xlu1 %91 }
 0x2bf   :  { %v95_v19 = vsel %vm77_vm6, %v92_v18, %v90_v16 }
 0x2c0   :  { %96 = vrot.lane.b32.xlu0 %v95_v19, %s146_s20 }
 0x332   :  { %v97_v20 = vpop.permute.xlu0 %96 }
 0x333   :  { %v100_v21 = vsel %vm80_vm9, %v97_v20, %v95_v19 }
 0x334   :  { %101 = vrot.lane.b32.xlu1 %v100_v21, %s147_s21 }
 0x3a6   :  { %v102_v23 = vpop.permute.xlu1 %101 }
 0x3a7   :  { %v105_v24 = vadd.f32 %v104_v22, %v102_v23 }
 0x3a9   :  { %v107_v25 = vand.u32 2147483647, %v105_v24  ;;  %v106_v36 = vmin.f32 %v105_v24, 0.0 }
 0x3ab   :  { %v108_v26 = vsub.f32 0.0, %v107_v25 }
 0x3ad   :  { %v109_v27 = vmul.f32 1.442695, %v108_v26 }
 0x3af   :  { %136 = vpow2.f32 %v109_v27 }
 0x3b9   :  { %v137_v28 = vpop.eup %136 }
 0x3ba   :  { %v111_v29 = vadd.f32 1.0, %v137_v28  ;;  %v114_v30 = vmul.f32 -0.5, %v137_v28  ;;  %v117_v32 = vand.u32 2147483647, %v137_v28 }
 0x3bc   :  { %138 = vlog2.f32 %v111_v29  ;;  %v115_v31 = vadd.f32 1.0, %v114_v30  ;;  %vm118_vm10 = vcmp.lt.f32.partialorder %v117_v32, 0.0004427343 }
 0x3be   :  { %v116_v35 = vmul.f32 %v137_v28, %v115_v31 }
 0x3c6   :  { %v139_v33 = vpop.eup %138 }
 0x3c7   :  { %v113_v34 = vmul.f32 0.6931472, %v139_v33 }
 0x3c9   :  { %v119_v37 = vsel %vm118_vm10, %v116_v35, %v113_v34 }
 0x3ca   :  { %v120_v38 = vsub.f32 %v106_v36, %v119_v37 }
 0x3cc   :  { %122 = vst.msk [vmem:[%s183_s3] sm:$0x3] %vm121_vm11, %v120_v38 }

</bundles_post_ra>
